<compile_context>
chip_gen: v5e
topology: v5e:2x2
jax: 0.10.0
libtpu: 0.0.40
codegen_flags: <defaults>
</compile_context>

<pallas_src>
import jax
import jax.numpy as jnp
from jax.experimental import pallas as pl
from jax.experimental.pallas import tpu as pltpu


def st_layer_kernel(len_ref, x_ref, w1_ref, w2_ref, out_ref, m_sc, l_sc, acc_sc):
    s_idx = pl.program_id(1)
    TB, TS, D = x_ref.shape

    @pl.when(s_idx == 0)
    def _init():
        m_sc[...] = jnp.full_like(m_sc, -jnp.inf)
        l_sc[...] = jnp.zeros_like(l_sc)
        acc_sc[...] = jnp.zeros_like(acc_sc)

    x = x_ref[...]                                    # (TB, TS, D), input dtype
    w1 = w1_ref[...]                                  # (D, D)
    w2 = w2_ref[...].astype(jnp.float32)              # (1, D)  (= w_2.T)

    # v = tanh(x @ w1): MXU matmul with f32 accumulation, tanh on the EUP.
    v = jnp.tanh(
        jnp.dot(x.reshape(TB * TS, D), w1, preferred_element_type=jnp.float32)
    ).reshape(TB, TS, D)                              # (TB, TS, D) f32

    # att = v . w_2 : VPU multiply + lane reduction (avoids an N=1 MXU matmul
    # and the (B*S, 1) relayout it would force).
    att = jnp.sum(v * w2, axis=-1)                    # (TB, TS) f32

    # masked_fill(mask == 0, -1e10): rebuild the prefix mask from seq lengths.
    pos = s_idx * TS + jax.lax.broadcasted_iota(jnp.int32, (TB, TS), 1)
    att = jnp.where(pos < len_ref[...], att, jnp.float32(-1e10))

    # Online softmax update over the sequence axis.
    m_prev = m_sc[...]                                # (TB, 1)
    m_new = jnp.maximum(m_prev, jnp.max(att, axis=-1, keepdims=True))
    alpha = jnp.exp(m_prev - m_new)                   # (TB, 1)
    p = jnp.exp(att - m_new)                          # (TB, TS)
    l_sc[...] = alpha * l_sc[...] + jnp.sum(p, axis=-1, keepdims=True)

    # Weighted pooling over this S tile as an MXU contraction over TS:
    #   (TB, 1, TS) @ (TB, TS, D) -> (TB, 1, D); avoids a full (TB, TS, D) f32
    #   upcast of x plus a sublane reduce / store-slot pressure.
    contrib = jnp.einsum(
        "bqs,bsd->bqd", p[:, None, :].astype(x.dtype), x,
        preferred_element_type=jnp.float32)[:, 0, :]  # (TB, D) f32
    acc_sc[...] = alpha * acc_sc[...] + contrib
    m_sc[...] = m_new

    @pl.when(s_idx == pl.num_programs(1) - 1)
    def _finalize():
        l = l_sc[...]
        inv = pl.reciprocal(l, approx=True)           # EUP vrcp (own bundle slot)
        inv = inv * (2.0 - l * inv)                   # one Newton step -> ~f32 exact
        out_ref[...] = (acc_sc[...] * inv).astype(out_ref.dtype)


def st_layer_forward(x, mask, w1, w2, *, block_b=8, block_s=512,
                     vmem_limit_bytes=32 * 1024 * 1024):
    """x: (B, S, D); mask: (B, 1, 1, S) prefix mask; w1: (D, D); w2: (D, 1)."""
    B, S, D = x.shape

    # ST_layer.getMask produces prefix masks (1 for pos < seq_len); recover the
    # per-row valid lengths so the kernel rebuilds the mask from an iota instead
    # of streaming a (B, S) float mask from HBM.
    seq_len = jnp.sum((mask.reshape(B, S) != 0).astype(jnp.int32), axis=1)

    # Tile sizes: use the whole extent if it fits one tile, otherwise
    # sublane-friendly blocks (block_b, block_s are multiples of 8).
    TB = B if B <= block_b else block_b
    TS = S if S <= block_s else block_s
    B_p = pl.cdiv(B, TB) * TB
    S_p = pl.cdiv(S, TS) * TS
    if (B_p, S_p) != (B, S):
        x = jnp.pad(x, ((0, B_p - B), (0, S_p - S), (0, 0)))
        seq_len = jnp.pad(seq_len, (0, B_p - B))
    seq_len = seq_len.reshape(B_p, 1)

    grid = (B_p // TB, S_p // TS)

    out = pl.pallas_call(
        st_layer_kernel,
        out_shape=jax.ShapeDtypeStruct((B_p, D), x.dtype),
        grid_spec=pltpu.PrefetchScalarGridSpec(
            num_scalar_prefetch=0,
            grid=grid,
            in_specs=[
                pl.BlockSpec((TB, 1), lambda b, s: (b, 0)),         # seq lengths
                pl.BlockSpec((TB, TS, D), lambda b, s: (b, s, 0)),  # x tiles
                pl.BlockSpec((D, D), lambda b, s: (0, 0)),          # w1 (resident)
                pl.BlockSpec((1, D), lambda b, s: (0, 0)),          # w2^T (resident)
            ],
            out_specs=pl.BlockSpec((TB, D), lambda b, s: (b, 0)),
            scratch_shapes=[
                pltpu.VMEM((TB, 1), jnp.float32),   # running max   m
                pltpu.VMEM((TB, 1), jnp.float32),   # running denom l
                pltpu.VMEM((TB, D), jnp.float32),   # running weighted sum
            ],
        ),
        compiler_params=pltpu.CompilerParams(
            dimension_semantics=("parallel", "arbitrary"),
            vmem_limit_bytes=vmem_limit_bytes,
        ),
    )(seq_len, x, w1, w2.reshape(1, D))
    return out[:B]


def reference_forward(x, mask, w1, w2):
    """Pure-JAX reference mirroring the PyTorch module."""
    v = jnp.tanh(jnp.einsum("bsd,de->bse", x, w1))
    att = jnp.einsum("bsd,do->bs", v, w2)
    m = mask.reshape(x.shape[0], x.shape[1])
    att = jnp.where(m == 0, -10000000000.0, att)
    score = jax.nn.softmax(att, axis=1)[:, :, None]
    return jnp.sum(x * score, axis=1)


if __name__ == "__main__":
    key = jax.random.PRNGKey(0)
    k_x, k_w1, k_w2, k_x2, k_len = jax.random.split(key, 5)

    # --- Test 1: shapes from the module spec (batch=2, max_seq_len=8, D=32) ---
    B, S, D = 2, 8, 32
    x = jax.random.normal(k_x, (B, S, D), dtype=jnp.float32)
    w1 = jax.random.uniform(k_w1, (D, D), minval=-0.1, maxval=0.1, dtype=jnp.float32)
    w2 = jax.random.uniform(k_w2, (D, 1), minval=-0.1, maxval=0.1, dtype=jnp.float32)
    seq_lengths = jnp.array([8, 5], dtype=jnp.int32)
    mask = (jnp.arange(S)[None, :] < seq_lengths[:, None]).astype(jnp.float32)
    mask = mask[:, None, None, :]                     # (B, 1, 1, S)

    out = jax.block_until_ready(st_layer_forward(x, mask, w1, w2))
    ref = reference_forward(x, mask, w1, w2)
    assert out.shape == (B, D)
    assert jnp.allclose(out, ref, atol=1e-4, rtol=1e-4), (
        f"max abs err {jnp.max(jnp.abs(out - ref))}")

    # --- Test 2: exercise the multi-tile grid (batch padding + online softmax
    #             accumulation across several S tiles). ---
    B2, S2 = 10, 24
    x2 = jax.random.normal(k_x2, (B2, S2, D), dtype=jnp.float32)
    lens2 = jax.random.randint(k_len, (B2,), 1, S2 + 1)
    mask2 = (jnp.arange(S2)[None, :] < lens2[:, None]).astype(jnp.float32)
    mask2 = mask2[:, None, None, :]
    out2 = jax.block_until_ready(
        st_layer_forward(x2, mask2, w1, w2, block_b=8, block_s=8))
    ref2 = reference_forward(x2, mask2, w1, w2)
    assert out2.shape == (B2, D)
    assert jnp.allclose(out2, ref2, atol=1e-4, rtol=1e-4), (
        f"max abs err {jnp.max(jnp.abs(out2 - ref2))}")

    print("KERNEL_OK")
</pallas_src>

<mosaic_0001>
module attributes {stable_mosaic.version = 11 : i64} {
  func.func @st_layer_kernel(%arg0: i32, %arg1: i32, %arg2: memref<2x1xi32, #tpu.memory_space<vmem>>, %arg3: memref<2x8x32xf32, #tpu.memory_space<vmem>>, %arg4: memref<32x32xf32, #tpu.memory_space<vmem>>, %arg5: memref<1x32xf32, #tpu.memory_space<vmem>>, %arg6: memref<2x32xf32, #tpu.memory_space<vmem>>, %arg7: memref<2x1xf32, #tpu.memory_space<vmem>>, %arg8: memref<2x1xf32, #tpu.memory_space<vmem>>, %arg9: memref<2x32xf32, #tpu.memory_space<vmem>>) attributes {dimension_semantics = [#tpu.dimension_semantics<parallel>, #tpu.dimension_semantics<arbitrary>], iteration_bounds = array<i64: 1, 1>, scalar_prefetch = 0 : i64, scratch_operands = 3 : i64, tpu.core_type = #tpu.core_type<tc>, window_params = [{transform_indices = @transform_0, window_bounds = array<i64: 2, 1>}, {transform_indices = @transform_1, window_bounds = array<i64: 2, 8, 32>}, {pipeline_mode = #tpu.pipeline_mode<synchronous>, transform_indices = @transform_2, window_bounds = array<i64: 32, 32>}, {pipeline_mode = #tpu.pipeline_mode<synchronous>, transform_indices = @transform_3, window_bounds = array<i64: 1, 32>}, {transform_indices = @transform_4, window_bounds = array<i64: 2, 32>}]} {
    %c0_i32 = arith.constant 0 : i32
    %0 = arith.cmpi eq, %arg1, %c0_i32 : i32
    %1 = arith.extui %0 : i1 to i32
    %c0_i32_0 = arith.constant 0 : i32
    %2 = arith.cmpi ne, %1, %c0_i32_0 : i32
    scf.if %2 {
      %cst_28 = arith.constant 0xFF800000 : f32
      %50 = vector.broadcast %cst_28 : f32 to vector<2x1xf32>
      %c0_29 = arith.constant 0 : index
      %c0_30 = arith.constant 0 : index
      %51 = vector.load %arg7[%c0_29, %c0_30] : memref<2x1xf32, #tpu.memory_space<vmem>>, vector<2x1xf32>
      tpu.vector_store %arg7[%c0_29, %c0_30], %50 {strides = array<i32>} : memref<2x1xf32, #tpu.memory_space<vmem>>, vector<2x1xf32>,
      %cst_31 = arith.constant 0.000000e+00 : f32
      %52 = vector.broadcast %cst_31 : f32 to vector<2x1xf32>
      %c0_32 = arith.constant 0 : index
      %c0_33 = arith.constant 0 : index
      %53 = vector.load %arg8[%c0_32, %c0_33] : memref<2x1xf32, #tpu.memory_space<vmem>>, vector<2x1xf32>
      tpu.vector_store %arg8[%c0_32, %c0_33], %52 {strides = array<i32>} : memref<2x1xf32, #tpu.memory_space<vmem>>, vector<2x1xf32>,
      %cst_34 = arith.constant 0.000000e+00 : f32
      %54 = vector.broadcast %cst_34 : f32 to vector<2x32xf32>
      %c0_35 = arith.constant 0 : index
      %c0_36 = arith.constant 0 : index
      %55 = vector.load %arg9[%c0_35, %c0_36] : memref<2x32xf32, #tpu.memory_space<vmem>>, vector<2x32xf32>
      tpu.vector_store %arg9[%c0_35, %c0_36], %54 {strides = array<i32>} : memref<2x32xf32, #tpu.memory_space<vmem>>, vector<2x32xf32>,
    } else {
    }
    %c0 = arith.constant 0 : index
    %c0_1 = arith.constant 0 : index
    %c0_2 = arith.constant 0 : index
    %3 = vector.load %arg3[%c0, %c0_1, %c0_2] : memref<2x8x32xf32, #tpu.memory_space<vmem>>, vector<2x8x32xf32>
    %c0_3 = arith.constant 0 : index
    %c0_4 = arith.constant 0 : index
    %4 = vector.load %arg4[%c0_3, %c0_4] : memref<32x32xf32, #tpu.memory_space<vmem>>, vector<32x32xf32>
    %c0_5 = arith.constant 0 : index
    %c0_6 = arith.constant 0 : index
    %5 = vector.load %arg5[%c0_5, %c0_6] : memref<1x32xf32, #tpu.memory_space<vmem>>, vector<1x32xf32>
    %6 = vector.shape_cast %3 : vector<2x8x32xf32> to vector<16x32xf32>
    %cst = arith.constant dense<0.000000e+00> : vector<16x32xf32>
    %7 = tpu.matmul %6, %4, %cst {dimension_numbers = #tpu.dot_dimension_numbers<[1], [0], [0], [1], [0, 0, 1, 1], [], []>} : vector<16x32xf32>, vector<32x32xf32>, vector<16x32xf32> -> vector<16x32xf32>
    %8 = math.tanh %7 : vector<16x32xf32>
    %9 = vector.shape_cast %8 : vector<16x32xf32> to vector<2x8x32xf32>
    %10 = vector.shape_cast %5 : vector<1x32xf32> to vector<1x1x32xf32>
    %11 = vector.broadcast %10 : vector<1x1x32xf32> to vector<2x8x32xf32>
    %12 = arith.mulf %9, %11 : vector<2x8x32xf32>
    %cst_7 = arith.constant dense<0.000000e+00> : vector<2x8xf32>
    %13 = vector.multi_reduction <add>, %12, %cst_7 [2] : vector<2x8x32xf32> to vector<2x8xf32>
    %c8_i32 = arith.constant 8 : i32
    %14 = arith.muli %arg1, %c8_i32 : i32
    %15 = tpu.iota {dimensions = array<i32: 1>} : vector<2x8xi32>
    %16 = vector.broadcast %14 : i32 to vector<2x8xi32>
    %17 = arith.addi %16, %15 : vector<2x8xi32>
    %c0_8 = arith.constant 0 : index
    %c0_9 = arith.constant 0 : index
    %18 = vector.load %arg2[%c0_8, %c0_9] : memref<2x1xi32, #tpu.memory_space<vmem>>, vector<2x1xi32>
    %19 = vector.broadcast %18 : vector<2x1xi32> to vector<2x8xi32>
    %20 = arith.cmpi slt, %17, %19 : vector<2x8xi32>
    %cst_10 = arith.constant -1.000000e+10 : f32
    %21 = vector.broadcast %cst_10 : f32 to vector<2x8xf32>
    %22 = arith.select %20, %13, %21 : vector<2x8xi1>, vector<2x8xf32>
    %c0_11 = arith.constant 0 : index
    %c0_12 = arith.constant 0 : index
    %23 = vector.load %arg7[%c0_11, %c0_12] : memref<2x1xf32, #tpu.memory_space<vmem>>, vector<2x1xf32>
    %cst_13 = arith.constant dense<0xFF800000> : vector<2xf32>
    %24 = vector.multi_reduction <maximumf>, %22, %cst_13 [1] : vector<2x8xf32> to vector<2xf32>
    %25 = vector.shape_cast %24 : vector<2xf32> to vector<2x1xf32>
    %26 = arith.maximumf %23, %25 : vector<2x1xf32>
    %27 = arith.subf %23, %26 : vector<2x1xf32>
    %28 = math.exp %27 : vector<2x1xf32>
    %29 = vector.broadcast %26 : vector<2x1xf32> to vector<2x8xf32>
    %30 = arith.subf %22, %29 : vector<2x8xf32>
    %31 = math.exp %30 : vector<2x8xf32>
    %c0_14 = arith.constant 0 : index
    %c0_15 = arith.constant 0 : index
    %32 = vector.load %arg8[%c0_14, %c0_15] : memref<2x1xf32, #tpu.memory_space<vmem>>, vector<2x1xf32>
    %33 = arith.mulf %28, %32 : vector<2x1xf32>
    %cst_16 = arith.constant dense<0.000000e+00> : vector<2xf32>
    %34 = vector.multi_reduction <add>, %31, %cst_16 [1] : vector<2x8xf32> to vector<2xf32>
    %35 = vector.shape_cast %34 : vector<2xf32> to vector<2x1xf32>
    %36 = arith.addf %33, %35 : vector<2x1xf32>
    %c0_17 = arith.constant 0 : index
    %c0_18 = arith.constant 0 : index
    %37 = vector.load %arg8[%c0_17, %c0_18] : memref<2x1xf32, #tpu.memory_space<vmem>>, vector<2x1xf32>
    tpu.vector_store %arg8[%c0_17, %c0_18], %36 {strides = array<i32>} : memref<2x1xf32, #tpu.memory_space<vmem>>, vector<2x1xf32>,
    %38 = vector.shape_cast %31 : vector<2x8xf32> to vector<2x1x8xf32>
    "tpu.trace_start"() <{level = 10 : i32, message = "bqs,bsd->bqd"}> : () -> ()
    %cst_19 = arith.constant dense<0.000000e+00> : vector<2x1x32xf32>
    %39 = tpu.matmul %38, %3, %cst_19 {dimension_numbers = #tpu.dot_dimension_numbers<[2], [1], [1], [2], [0, 0, 0, 1, 1, 2], [0], [0]>} : vector<2x1x8xf32>, vector<2x8x32xf32>, vector<2x1x32xf32> -> vector<2x1x32xf32>
    "tpu.trace_stop"() : () -> ()
    %40 = vector.shape_cast %39 : vector<2x1x32xf32> to vector<2x32xf32>
    %c0_20 = arith.constant 0 : index
    %c0_21 = arith.constant 0 : index
    %41 = vector.load %arg9[%c0_20, %c0_21] : memref<2x32xf32, #tpu.memory_space<vmem>>, vector<2x32xf32>
    %42 = vector.broadcast %28 : vector<2x1xf32> to vector<2x32xf32>
    %43 = arith.mulf %42, %41 : vector<2x32xf32>
    %44 = arith.addf %43, %40 : vector<2x32xf32>
    %c0_22 = arith.constant 0 : index
    %c0_23 = arith.constant 0 : index
    %45 = vector.load %arg9[%c0_22, %c0_23] : memref<2x32xf32, #tpu.memory_space<vmem>>, vector<2x32xf32>
    tpu.vector_store %arg9[%c0_22, %c0_23], %44 {strides = array<i32>} : memref<2x32xf32, #tpu.memory_space<vmem>>, vector<2x32xf32>,
    %c0_24 = arith.constant 0 : index
    %c0_25 = arith.constant 0 : index
    %46 = vector.load %arg7[%c0_24, %c0_25] : memref<2x1xf32, #tpu.memory_space<vmem>>, vector<2x1xf32>
    tpu.vector_store %arg7[%c0_24, %c0_25], %26 {strides = array<i32>} : memref<2x1xf32, #tpu.memory_space<vmem>>, vector<2x1xf32>,
    %c0_i32_26 = arith.constant 0 : i32
    %47 = arith.cmpi eq, %arg1, %c0_i32_26 : i32
    %48 = arith.extui %47 : i1 to i32
    %c0_i32_27 = arith.constant 0 : i32
    %49 = arith.cmpi ne, %48, %c0_i32_27 : i32
    scf.if %49 {
      %c0_28 = arith.constant 0 : index
      %c0_29 = arith.constant 0 : index
      %50 = vector.load %arg8[%c0_28, %c0_29] : memref<2x1xf32, #tpu.memory_space<vmem>>, vector<2x1xf32>
      %51 = tpu.reciprocal %50 {approx = true} : vector<2x1xf32> -> vector<2x1xf32>
      %52 = arith.mulf %50, %51 : vector<2x1xf32>
      %cst_30 = arith.constant 2.000000e+00 : f32
      %53 = vector.broadcast %cst_30 : f32 to vector<2x1xf32>
      %54 = arith.subf %53, %52 : vector<2x1xf32>
      %55 = arith.mulf %51, %54 : vector<2x1xf32>
      %c0_31 = arith.constant 0 : index
      %c0_32 = arith.constant 0 : index
      %56 = vector.load %arg9[%c0_31, %c0_32] : memref<2x32xf32, #tpu.memory_space<vmem>>, vector<2x32xf32>
      %57 = vector.broadcast %55 : vector<2x1xf32> to vector<2x32xf32>
      %58 = arith.mulf %56, %57 : vector<2x32xf32>
      %c0_33 = arith.constant 0 : index
      %c0_34 = arith.constant 0 : index
      %59 = vector.load %arg6[%c0_33, %c0_34] : memref<2x32xf32, #tpu.memory_space<vmem>>, vector<2x32xf32>
      tpu.vector_store %arg6[%c0_33, %c0_34], %58 {strides = array<i32>} : memref<2x32xf32, #tpu.memory_space<vmem>>, vector<2x32xf32>,
    } else {
    }
    return
  }
  func.func @transform_0(%arg0: i32, %arg1: i32) -> (i32, i32) {
    %c0_i32 = arith.constant 0 : i32
    %c0_i32_0 = arith.constant 0 : i32
    return %arg0, %c0_i32 : i32, i32
  }
  func.func @transform_1(%arg0: i32, %arg1: i32) -> (i32, i32, i32) {
    %c0_i32 = arith.constant 0 : i32
    %c0_i32_0 = arith.constant 0 : i32
    return %arg0, %arg1, %c0_i32 : i32, i32, i32
  }
  func.func @transform_2(%arg0: i32, %arg1: i32) -> (i32, i32) {
    %c0_i32 = arith.constant 0 : i32
    %c0_i32_0 = arith.constant 0 : i32
    %c0_i32_1 = arith.constant 0 : i32
    return %c0_i32, %c0_i32_0 : i32, i32
  }
  func.func @transform_3(%arg0: i32, %arg1: i32) -> (i32, i32) {
    %c0_i32 = arith.constant 0 : i32
    %c0_i32_0 = arith.constant 0 : i32
    %c0_i32_1 = arith.constant 0 : i32
    return %c0_i32, %c0_i32_0 : i32, i32
  }
  func.func @transform_4(%arg0: i32, %arg1: i32) -> (i32, i32) {
    %c0_i32 = arith.constant 0 : i32
    %c0_i32_0 = arith.constant 0 : i32
    return %arg0, %c0_i32 : i32, i32
  }
}

</mosaic_0001>

<bundles_post_ra>
// kernel: tpu_custom_call.1
= control target key start
LH: loop header
LB: loop body
LE: loop exit
PB: predicated region body
PF: predicated region fallthrough
CT: control target
= control target key end

     0   :  { %9 = vsyncpa [#allocation6], 0  ;;  %s420_s0 = inlined_call_operand.vmem [shape: s32[2,1], index: 0, kind: input, shape index: {}]   ;;  %s421_s1 = inlined_call_operand.hbm [shape: f32[2,8,32], index: 1, kind: input, shape index: {}]   ;;  %s422_s2 = inlined_call_operand.hbm [shape: f32[32,32], index: 2, kind: input, shape index: {}]   ;;  %s423_s3 = inlined_call_operand.vmem [shape: f32[1,32], index: 3, kind: input, shape index: {}]   ;;  %s424_s4 = inlined_call_operand.hbm [shape: f32[2,32], index: 4, kind: output, shape index: {}]  }
   0x1   :  { %10 = vsyncpa [#allocation9], 0 }
   0x2   :  { %11 = vsyncpa [#allocation7], 0  ;;  %s18_s17 = sshll.u32 %s421_s1, 4  ;;  %s357_s18 = smov [#allocation5]   ;;  %s19_s17 = int_to_ptr.hbm [resolvable:$true] %s18_s17 }
   0x3   :  { %s20_s19 = sshll.u32 %s357_s18, 4  ;;  %s31_s22 = sshll.u32 %s422_s2, 4  ;;  %s21_s19 = int_to_ptr.vmem [resolvable:$true] %s20_s19  ;;  %s32_s22 = int_to_ptr.hbm [resolvable:$true] %s31_s22 }
   0x4   :  { %s358_s23 = smov 128   ;;  %s359_s24 = smov 8  }
   0x5   :  { %26 = dma.hbm_to_vmem [thread:$0]  %s19_s17, 256, %s21_s19, [#allocation6], %s358_s23, %s358_s23, %s359_s24  }
   0x6   :  { %s360_s25 = smov [#allocation8]  }
   0x7   :  { %s33_s26 = sshll.u32 %s360_s25, 4  ;;  %s34_s26 = int_to_ptr.vmem [resolvable:$true] %s33_s26 }
   0x8   :  { %39 = dma.hbm_to_vmem [thread:$0]  %s32_s22, 512, %s34_s26, [#allocation9], %s358_s23, %s358_s23, %s359_s24  }
   0x9   :  { %351 = dma.done.wait [#allocation6], 256  }
   0xa   :  { %352 = vsyncadd [#allocation6], 4294967040 }
   0xb   :  { %353 = dma.done.wait [#allocation9], 512  }
   0xc   :  { %354 = vsyncadd [#allocation9], 4294966784  ;;  %v64_v0 = vld [vmem:[#allocation8 + $0x18] sm:$0xff]  ;;  %v63_v1 = vld [vmem:[#allocation8 + $0x10] sm:$0xff]  ;;  %vm66_vm0 = vcmask 261120   ;;  %v361_v7 = vmov 0   ;;  %v110_v19 = vlaneseq }
   0xd   :  { %85 = vmatpush.msra.mxu0 %v64_v0  ;;  %253 = vmatpush.msra.mxu3 %v64_v0  ;;  %v59_v2 = vld [vmem:[#allocation5] sm:$0xff]  ;;  %v60_v3 = vld [vmem:[#allocation5 + $0x8] sm:$0xff]  ;;  %v62_v4 = vld [vmem:[#allocation8 + $0x8] sm:$0xff]  ;;  %vm54_vm1 = vcmask 1024   ;;  %v362_v17 = vmov -inf   ;;  %vm123_vm2 = vcmask 1041409  }
   0xe   :  { %172 = vmatpush.msra.mxu1 %v59_v2  ;;  %194 = vmatpush.msra.mxu2 %v60_v3  ;;  %v61_v5 = vld [vmem:[#allocation8] sm:$0xff]  ;;  %v114_v6 = vld [vmem:[%s420_s0] sm:$0x3]  ;;  %55 = vst.msk [vmem:[#allocation2] sm:$0x3] %vm54_vm1, %v362_v17  ;;  %v111_v20 = vand.u32 127, %v110_v19 }
   0xf   :  { %86 = vmatpush.msra.mxu0 %v63_v1  ;;  %254 = vmatpush.msra.mxu3 %v63_v1  ;;  %v268_v9 = vld [vmem:[%s423_s3] ss:$0 sm:$0xff]  ;;  %vm128_vm4 = vcmask 58368   ;;  %v363_v28 = vmov 0.0   ;;  %vm57_vm5 = vcmask 254976   ;;  %vm154_vm6 = vcmask 64512  }
  0x10   :  { %265 = vset.pattern.permute.xlu1 %v361_v7  ;;  %266 = vset.pattern.permute.xlu2 %v361_v7  ;;  %56 = vst.msk [vmem:[#allocation3] sm:$0x3] %vm54_vm1, %v363_v28  ;;  %s364_s0 = smov [#allocation10]   ;;  %s238_s5 = sshll.u32 %s424_s4, 4  ;;  %s239_s5 = int_to_ptr.hbm [resolvable:$true] %s238_s5 }
  0x11   :  { %87 = vmatpush.msra.mxu0 %v62_v4  ;;  %255 = vmatpush.msra.mxu3 %v62_v4  ;;  %58 = vst.msk [vmem:[#allocation4] sm:$0x3] %vm57_vm5, %v363_v28  ;;  %s236_s3 = sshll.u32 %s364_s0, 4  ;;  %s237_s3 = int_to_ptr.vmem [resolvable:$true] %s236_s3 }
  0x12   :  { %116 = vperm.xlu1 %265, %v114_v6   ;;  %267 = vset.pattern.permute.xlu0 %v361_v7 }
  0x13   :  { %88 = vmatpush.msra.mxu0 %v61_v5  ;;  %256 = vmatpush.msra.mxu3 %v61_v5 }
  0x14   :  { %249 = vmatmul.msk.f32.vlgmr.msra.gmra.mxu0 %vm66_vm0, %v59_v2  ;;  %250 = vmatmul.msk.f32.vlgmr.msra.gmra.mxu3 %vm66_vm0, %v60_v3 }
  0x15   :  { %v127_v29 = vld [vmem:[#allocation2] sm:$0x3] }
  0x17   :  { %v144_v41 = vld [vmem:[#allocation3] sm:$0x3] }
  0x18   :  { %v199_v46 = vld [vmem:[#allocation4] sm:$0x3] }
  0x84   :  { %v117_v21 = vpop.permute.xlu1 %116 }
  0x85   :  { %vm118_vm3 = vcmp.lt.s32.totalorder %v111_v20, %v117_v21 }
  0x91   :  { %v90_v8 = vpop.f32.mrf.mxu0 }
  0x92   :  { %269 = vtanh.f32 %v90_v8 }
  0x97   :  { %v93_v10 = vpop.f32.mrf.mxu3 }
  0x98   :  { %v270_v11 = vpop.eup %269  ;;  %271 = vtanh.f32 %v93_v10 }
  0x99   :  { %v101_v12 = vmul.f32 %v270_v11, %v268_v9 }
  0x9b   :  { %v103_v13 = vsel %vm66_vm0, %v101_v12, 0.0 }
  0x9c   :  { %104 = vadd.xlane.f32.xlu0 %v103_v13 }
  0x9e   :  { %v272_v14 = vpop.eup %271 }
  0x9f   :  { %v102_v15 = vmul.f32 %v272_v14, %v268_v9 }
  0xa1   :  { %v106_v16 = vsel %vm66_vm0, %v102_v15, 0.0 }
  0xa4   :  { %107 = vadd.xlane.f32.xlu0 %v106_v16 }
 0x10f   :  { %v105_v18 = vpop.xlane.xlu0 %104 }
 0x110   :  { %v121_v23 = vperm.slane %v105_v18, %v111_v20 }
 0x117   :  { %v108_v22 = vpop.xlane.xlu0 %107 }
 0x118   :  { %v122_v24 = vperm.slane %v108_v22, %v111_v20 }
 0x11a   :  { %v124_v25 = vsel %vm123_vm2, %v122_v24, %v121_v23 }
 0x11b   :  { %v126_v26 = vsel %vm118_vm3, %v124_v25, -1e+10 }
 0x11c   :  { %v129_v27 = vsel %vm128_vm4, %v126_v26, -inf }
 0x11d   :  { %130 = vmax.xlane.f32.xlu1 %v129_v27 }
 0x190   :  { %v131_v30 = vpop.xlane.xlu1 %130 }
 0x191   :  { %v132_v31 = vmax.f32 %v127_v29, %v131_v30 }
 0x193   :  { %v133_v32 = vsub.f32 %v127_v29, %v132_v31  ;;  %214 = vst.msk [vmem:[#allocation2] sm:$0x3] %vm54_vm1, %v132_v31  ;;  %138 = vperm.xlu2 %266, %v132_v31  }
 0x195   :  { %v134_v33 = vmul.f32 1.442695, %v133_v32 }
 0x197   :  { %273 = vpow2.f32 %v134_v33 }
 0x19d   :  { %v274_v34 = vpop.eup %273 }
 0x19e   :  { %202 = vperm.xlu0 %267, %v274_v34   ;;  %v145_v42 = vmul.f32 %v274_v34, %v144_v41 }
 0x1ed   :  { %v139_v35 = vpop.permute.xlu2 %138 }
 0x1ee   :  { %v141_v36 = vsub.f32 %v126_v26, %v139_v35 }
 0x1f0   :  { %v142_v37 = vmul.f32 1.442695, %v141_v36 }
 0x1f2   :  { %275 = vpow2.f32 %v142_v37 }
 0x1f8   :  { %v276_v38 = vpop.eup %275 }
 0x1f9   :  { %251 = vmatmul.msk.f32.vlgmr.msra.gmra.mxu1 %vm154_vm6, %v276_v38  ;;  %v146_v39 = vsel %vm128_vm4, %v276_v38, 0.0  ;;  %v153_v40 = vrot.slane %v276_v38, 1 }
 0x1fa   :  { %147 = vadd.xlane.f32.xlu2 %v146_v39 }
 0x1fb   :  { %252 = vmatmul.msk.f32.vlgmr.msra.gmra.mxu2 %vm154_vm6, %v153_v40 }
 0x210   :  { %v203_v47 = vpop.permute.xlu0 %202 }
 0x211   :  { %v205_v52 = vmul.f32 %v203_v47, %v199_v46 }
 0x26d   :  { %v148_v43 = vpop.xlane.xlu2 %147 }
 0x26e   :  { %v149_v44 = vadd.f32 %v148_v43, %v145_v42 }
 0x270   :  { %151 = vst.msk [vmem:[#allocation3] sm:$0x3] %vm54_vm1, %v149_v44 }
 0x276   :  { %v174_v53 = vpop.f32.mrf.mxu1 }
 0x277   :  { %v218_v45 = vld [vmem:[#allocation3] sm:$0x3] }
 0x278   :  { %277 = vrcp.f32 %v218_v45 }
 0x27e   :  { %v278_v48 = vpop.eup %277  ;;  %v196_v49 = vpop.f32.mrf.mxu2 }
 0x27f   :  { %v208_v50 = vrot.slane %v196_v49, 7  ;;  %v220_v51 = vmul.f32 %v278_v48, %v218_v45 }
 0x281   :  { %v209_v54 = vsel %vm123_vm2, %v208_v50, %v174_v53  ;;  %v221_v55 = vsub.f32 2.0, %v220_v51 }
 0x282   :  { %v211_v56 = vadd.f32 %v209_v54, %v205_v52 }
 0x283   :  { %v222_v57 = vmul.f32 %v278_v48, %v221_v55 }
 0x284   :  { %213 = vst.msk [vmem:[#allocation4] sm:$0x3] %vm57_vm5, %v211_v56 }
 0x285   :  { %226 = vperm.xlu2 %266, %v222_v57  }
 0x28b   :  { %v223_v58 = vld [vmem:[#allocation4] sm:$0x3] }
 0x2df   :  { %v227_v59 = vpop.permute.xlu2 %226 }
 0x2e0   :  { %v229_v60 = vmul.f32 %v227_v59, %v223_v58 }
 0x2e2   :  { %230 = vst.msk [vmem:[#allocation10] sm:$0x3] %vm57_vm5, %v229_v60 }
 0x2e3   :  { %241 = dma.vmem_to_hbm [thread:$0]  %s237_s3, 32, %s239_s5, [#allocation7]  }
 0x2e4   :  { %355 = dma.done.wait [#allocation7], 32  }
 0x2e5   :  { %356 = vsyncadd [#allocation7], 4294967264 }
 0x2e6   :  { %246 = vsyncpa [#allocation6], 1 }
 0x2e7   :  { %247 = vsyncpa [#allocation9], 1 }
 0x2e8   :  { %248 = vsyncpa [#allocation7], 1 }

</bundles_post_ra>
